<compile_context>
chip_gen: v7x
topology: tpu7x:2x2x1
jax: 0.10.0
libtpu: 0.0.40
codegen_flags: <defaults>
</compile_context>

<pallas_src>
import functools
import math

import jax
import jax.numpy as jnp
from jax import lax
from jax.experimental import pallas as pl
from jax.experimental.pallas import tpu as pltpu


# ----------------------------- helpers ---------------------------------------


def _pick_tb(batch, seq):
    """Batch items packed per grid step.

    Targets ~128 MXU rows per projection matmul (TB*S >= 128 when possible),
    keeps >= 2 grid steps whenever batch > 1 (v7x has 2 TensorCores), and
    requires TB | batch so the block index_map stays trivial.
    """
    target = max(1, 128 // max(seq, 1))
    best = 1
    for tb in range(1, batch + 1):
        if batch % tb != 0 or tb > target:
            continue
        if batch // tb >= 2 or batch == 1:
            best = tb
    return best


# ----------------------------- kernels ---------------------------------------


def _mha_plain_kernel(x_ref, wq_ref, bq_ref, wk_ref, bk_ref, wv_ref, bv_ref,
                      wo_ref, bo_ref, out_ref, attn_ref, *, nhead):
    """No time_diffs: multi-head self-attention + fused out projection."""
    TB, S, D = x_ref.shape
    hd = D // nhead
    scale = 1.0 / math.sqrt(hd)

    x2d = x_ref[...].reshape(TB * S, D).astype(jnp.bfloat16)

    # Packed projections: [TB*S, D] x [D, D] on the MXU, f32 accumulation.
    q = (jnp.dot(x2d, wq_ref[...], preferred_element_type=jnp.float32)
         + bq_ref[...]) * scale
    k = jnp.dot(x2d, wk_ref[...], preferred_element_type=jnp.float32) + bk_ref[...]
    v = jnp.dot(x2d, wv_ref[...], preferred_element_type=jnp.float32) + bv_ref[...]

    q3 = q.reshape(TB, S, D).astype(jnp.bfloat16)
    k3 = k.reshape(TB, S, D).astype(jnp.bfloat16)
    v3 = v.reshape(TB, S, D).astype(jnp.bfloat16)

    dn_qk = (((2,), (2,)), ((0,), (0,)))   # contract head_dim, batch over TB
    dn_pv = (((2,), (1,)), ((0,), (0,)))   # contract keys,     batch over TB

    attn_acc = jnp.zeros((TB, S, S), jnp.float32)
    ctx = []                               # per-head context, concat -> [.., D]
    for h in range(nhead):                 # static unroll; nhead is small
        sl = slice(h * hd, (h + 1) * hd)
        s = lax.dot_general(q3[:, :, sl], k3[:, :, sl], dn_qk,
                            preferred_element_type=jnp.float32)     # [TB, S, S]
        m = jnp.max(s, axis=-1, keepdims=True)
        p = jnp.exp(s - m)
        p = p * pl.reciprocal(jnp.sum(p, axis=-1, keepdims=True), approx=True)
        attn_acc = attn_acc + p
        ctx.append(lax.dot_general(p.astype(jnp.bfloat16), v3[:, :, sl], dn_pv,
                                   preferred_element_type=jnp.float32))

    # One fused out-projection with a full D-deep contraction.
    o2d = jnp.concatenate(ctx, axis=-1).reshape(TB * S, D).astype(jnp.bfloat16)
    out = jnp.dot(o2d, wo_ref[...], preferred_element_type=jnp.float32) + bo_ref[...]

    out_ref[...] = out.reshape(TB, S, D)
    attn_ref[...] = attn_acc * (1.0 / nhead)


def _mha_time_kernel(x_ref, wq_ref, bq_ref, wk_ref, bk_ref, rb_ref, td_ref,
                     out_ref, attn_ref, *, nhead):
    """time_diffs path: head-averaged weights, recency decay, renorm, bmm(w, x).

    attn_output / V / out-proj are unused by the torch module on this branch,
    so those weights are never loaded.
    """
    TB, S, D = x_ref.shape
    hd = D // nhead
    scale = 1.0 / math.sqrt(hd)

    xb = x_ref[...]                                    # [TB, S, D] f32
    x2d = xb.reshape(TB * S, D).astype(jnp.bfloat16)

    q = (jnp.dot(x2d, wq_ref[...], preferred_element_type=jnp.float32)
         + bq_ref[...]) * scale
    k = jnp.dot(x2d, wk_ref[...], preferred_element_type=jnp.float32) + bk_ref[...]

    q3 = q.reshape(TB, S, D).astype(jnp.bfloat16)
    k3 = k.reshape(TB, S, D).astype(jnp.bfloat16)

    dn_qk = (((2,), (2,)), ((0,), (0,)))
    attn_acc = jnp.zeros((TB, S, S), jnp.float32)
    for h in range(nhead):
        sl = slice(h * hd, (h + 1) * hd)
        s = lax.dot_general(q3[:, :, sl], k3[:, :, sl], dn_qk,
                            preferred_element_type=jnp.float32)     # [TB, S, S]
        m = jnp.max(s, axis=-1, keepdims=True)
        p = jnp.exp(s - m)
        p = p * pl.reciprocal(jnp.sum(p, axis=-1, keepdims=True), approx=True)
        attn_acc = attn_acc + p

    attn_avg = attn_acc * (1.0 / nhead)

    rb = rb_ref[0]                                     # SMEM runtime scalar
    decay = jnp.exp(-rb * td_ref[...])                 # [TB, S, S] f32
    w = attn_avg * decay
    w = w * pl.reciprocal(jnp.sum(w, axis=-1, keepdims=True) + 1e-8, approx=True)

    # output = bmm(w, x); kept f32 (tiny FLOPs, feeds the visible output).
    dn_wx = (((2,), (1,)), ((0,), (0,)))
    out_ref[...] = lax.dot_general(w, xb, dn_wx,
                                   preferred_element_type=jnp.float32)
    attn_ref[...] = w


# ----------------------------- wrapper ----------------------------------------


def temporal_aware_attention(params, x, time_diffs=None, *, nhead,
                             recency_bias=0.1):
    """Pallas implementation of TemporalAwareAttention.forward (eval mode).

    Returns (output, attn_weights) exactly like the torch module.
    """
    wq, bq, wk, bk, wv, bv, wo, bo = params
    B, S, D = x.shape
    assert D % nhead == 0, "d_model must be divisible by nhead"
    hd = D // nhead
    # Lane-layout friendliness: D should ideally be a multiple of 128 and the
    # per-head dim a multiple of 8, otherwise head slicing forces relayouts.
    assert hd % 8 == 0, "head_dim should be a multiple of 8 for TPU layout"

    TB = _pick_tb(B, S)
    grid = (B // TB,)

    # bf16 operands for the MXU; accumulation stays f32 inside the kernels.
    wq_b, wk_b, wv_b, wo_b = (w.astype(jnp.bfloat16) for w in (wq, wk, wv, wo))

    out_shape = (jax.ShapeDtypeStruct((B, S, D), jnp.float32),
                 jax.ShapeDtypeStruct((B, S, S), jnp.float32))
    x_spec = pl.BlockSpec((TB, S, D), lambda b: (b, 0, 0))
    w_spec = pl.BlockSpec((D, D), lambda b: (0, 0))      # resident weights
    b_spec = pl.BlockSpec((1, D), lambda b: (0, 0))      # resident biases
    td_spec = pl.BlockSpec((TB, S, S), lambda b: (b, 0, 0))
    smem_spec = pl.BlockSpec(memory_space=pltpu.MemorySpace.SMEM)
    out_specs = (pl.BlockSpec((TB, S, D), lambda b: (b, 0, 0)),
                 pl.BlockSpec((TB, S, S), lambda b: (b, 0, 0)))
    cparams = pltpu.CompilerParams(
        dimension_semantics=("parallel",),
        vmem_limit_bytes=32 * 1024 * 1024)

    if time_diffs is not None:
        if time_diffs.shape[0] != B:          # mirrors torch: trim leading dim
            time_diffs = time_diffs[:B]
        td = time_diffs.astype(jnp.float32).reshape(B, S, S)
        rb = jnp.asarray([recency_bias], dtype=jnp.float32)  # SMEM scalar
        # q/k projections + per-head QK^T + final bmm(w, x)
        flops = B * (2 * 2 * S * D * D + 2 * S * S * D + 2 * S * S * D)
        cost = pl.CostEstimate(
            flops=int(flops),
            transcendentals=int(B * S * S * (nhead + 1)),
            bytes_accessed=int(4 * x.size + 2 * 2 * D * D + 4 * 2 * D
                               + 4 * td.size + 4 * B * S * D + 4 * B * S * S + 4))
        kernel = functools.partial(_mha_time_kernel, nhead=nhead)
        return pl.pallas_call(
            kernel,
            out_shape=out_shape,
            grid=grid,
            in_specs=[x_spec, w_spec, b_spec, w_spec, b_spec, smem_spec, td_spec],
            out_specs=out_specs,
            compiler_params=cparams,
            cost_estimate=cost,
        )(x, wq_b, bq, wk_b, bk, rb, td)

    # q/k/v projections + out-projection + per-head QK^T + P@V
    flops = B * (2 * 4 * S * D * D + 2 * 2 * S * S * D)
    cost = pl.CostEstimate(
        flops=int(flops),
        transcendentals=int(B * S * S * nhead),
        bytes_accessed=int(4 * x.size + 2 * 4 * D * D + 4 * 4 * D
                           + 4 * B * S * D + 4 * B * S * S))
    kernel = functools.partial(_mha_plain_kernel, nhead=nhead)
    return pl.pallas_call(
        kernel,
        out_shape=out_shape,
        grid=grid,
        in_specs=[x_spec, w_spec, b_spec, w_spec, b_spec, w_spec, b_spec,
                  w_spec, b_spec],
        out_specs=out_specs,
        compiler_params=cparams,
        cost_estimate=cost,
    )(x, wq_b, bq, wk_b, bk, wv_b, bv, wo_b, bo)


# --------------------------- reference (pure JAX, f32) -------------------------


def _reference(params, x, nhead, recency_bias, time_diffs=None):
    wq, bq, wk, bk, wv, bv, wo, bo = params
    B, S, D = x.shape
    hd = D // nhead
    q = x @ wq + bq
    k = x @ wk + bk
    v = x @ wv + bv

    def heads(t):
        return t.reshape(B, S, nhead, hd).transpose(0, 2, 1, 3)

    qh, kh, vh = heads(q), heads(k), heads(v)
    scores = jnp.einsum('bhqd,bhkd->bhqk', qh, kh) / math.sqrt(hd)
    p = jax.nn.softmax(scores, axis=-1)
    attn_w = p.mean(axis=1)                                   # head-averaged
    o = jnp.einsum('bhqk,bhkd->bhqd', p, vh)
    o = o.transpose(0, 2, 1, 3).reshape(B, S, D)
    attn_out = o @ wo + bo

    if time_diffs is not None:
        td = time_diffs[:B].astype(jnp.float32)
        decay = jnp.exp(-recency_bias * td)
        w = attn_w * decay
        w = w / (w.sum(-1, keepdims=True) + 1e-8)
        out = jnp.einsum('bqk,bkd->bqd', w, x)
        return out, w
    return attn_out, attn_w


# ------------------------------- main ------------------------------------------


if __name__ == "__main__":
    batch, seq, d_model, nhead = 2, 8, 128, 4
    recency_bias = 0.1

    key = jax.random.PRNGKey(0)
    ks = jax.random.split(key, 10)

    x = jax.random.normal(ks[0], (batch, seq, d_model), dtype=jnp.float32)

    def mk_w(k):
        return jax.random.normal(k, (d_model, d_model), jnp.float32) * 0.05

    def mk_b(k):
        return jax.random.normal(k, (1, d_model), jnp.float32) * 0.01

    params = (mk_w(ks[1]), mk_b(ks[2]),   # wq, bq
              mk_w(ks[3]), mk_b(ks[4]),   # wk, bk
              mk_w(ks[5]), mk_b(ks[6]),   # wv, bv
              mk_w(ks[7]), mk_b(ks[8]))   # wo, bo

    # pairwise time differences; leading dim deliberately larger than batch to
    # exercise the trimming branch of the torch forward.
    time_diffs = jax.random.uniform(ks[9], (batch + 2, seq, seq),
                                    dtype=jnp.float32, minval=0.0, maxval=10.0)

    out_t, attn_t = temporal_aware_attention(
        params, x, time_diffs, nhead=nhead, recency_bias=recency_bias)
    out_t, attn_t = jax.block_until_ready((out_t, attn_t))

    out_p, attn_p = temporal_aware_attention(
        params, x, None, nhead=nhead, recency_bias=recency_bias)
    out_p, attn_p = jax.block_until_ready((out_p, attn_p))

    ref_out_t, ref_attn_t = _reference(params, x, nhead, recency_bias, time_diffs)
    ref_out_p, ref_attn_p = _reference(params, x, nhead, recency_bias, None)

    # Tolerance accounts for bf16 MXU operands and pl.reciprocal(approx=True);
    # the pure-JAX reference stays full f32.
    tol = dict(atol=1e-2, rtol=1e-2)
    assert jnp.allclose(out_t, ref_out_t, **tol), "time output mismatch"
    assert jnp.allclose(attn_t, ref_attn_t, **tol), "time weights mismatch"
    assert jnp.allclose(out_p, ref_out_p, **tol), "plain output mismatch"
    assert jnp.allclose(attn_p, ref_attn_p, **tol), "plain weights mismatch"

    print("KERNEL_OK")
</pallas_src>

<mosaic_0001>
module attributes {stable_mosaic.version = 11 : i64} {
  func.func @_mha_time_kernel(%arg0: i32, %arg1: memref<1x8x128xf32, #tpu.memory_space<vmem>>, %arg2: memref<128x128xbf16, #tpu.memory_space<vmem>>, %arg3: memref<1x128xf32, #tpu.memory_space<vmem>>, %arg4: memref<128x128xbf16, #tpu.memory_space<vmem>>, %arg5: memref<1x128xf32, #tpu.memory_space<vmem>>, %arg6: memref<1xf32, #tpu.memory_space<smem>>, %arg7: memref<1x8x8xf32, #tpu.memory_space<vmem>>, %arg8: memref<1x8x128xf32, #tpu.memory_space<vmem>>, %arg9: memref<1x8x8xf32, #tpu.memory_space<vmem>>) attributes {dimension_semantics = [#tpu.dimension_semantics<parallel>], iteration_bounds = array<i64: 2>, scalar_prefetch = 0 : i64, scratch_operands = 0 : i64, tpu.core_type = #tpu.core_type<tc>, window_params = [{transform_indices = @transform_0, window_bounds = array<i64: 1, 8, 128>}, {pipeline_mode = #tpu.pipeline_mode<synchronous>, transform_indices = @transform_1, window_bounds = array<i64: 128, 128>}, {pipeline_mode = #tpu.pipeline_mode<synchronous>, transform_indices = @transform_2, window_bounds = array<i64: 1, 128>}, {pipeline_mode = #tpu.pipeline_mode<synchronous>, transform_indices = @transform_3, window_bounds = array<i64: 128, 128>}, {pipeline_mode = #tpu.pipeline_mode<synchronous>, transform_indices = @transform_4, window_bounds = array<i64: 1, 128>}, {transform_indices = @transform_5, window_bounds = array<i64: 1>}, {transform_indices = @transform_6, window_bounds = array<i64: 1, 8, 8>}, {transform_indices = @transform_7, window_bounds = array<i64: 1, 8, 128>}, {transform_indices = @transform_8, window_bounds = array<i64: 1, 8, 8>}]} {
    %c0 = arith.constant 0 : index
    %c0_0 = arith.constant 0 : index
    %c0_1 = arith.constant 0 : index
    %0 = vector.load %arg1[%c0, %c0_0, %c0_1] : memref<1x8x128xf32, #tpu.memory_space<vmem>>, vector<1x8x128xf32>
    %1 = vector.shape_cast %0 : vector<1x8x128xf32> to vector<8x128xf32>
    %2 = arith.truncf %1 : vector<8x128xf32> to vector<8x128xbf16>
    %c0_2 = arith.constant 0 : index
    %c0_3 = arith.constant 0 : index
    %3 = vector.load %arg2[%c0_2, %c0_3] : memref<128x128xbf16, #tpu.memory_space<vmem>>, vector<128x128xbf16>
    %cst = arith.constant dense<0.000000e+00> : vector<8x128xf32>
    %4 = tpu.matmul %2, %3, %cst {dimension_numbers = #tpu.dot_dimension_numbers<[1], [0], [0], [1], [0, 0, 1, 1], [], []>} : vector<8x128xbf16>, vector<128x128xbf16>, vector<8x128xf32> -> vector<8x128xf32>
    %c0_4 = arith.constant 0 : index
    %c0_5 = arith.constant 0 : index
    %5 = vector.load %arg3[%c0_4, %c0_5] : memref<1x128xf32, #tpu.memory_space<vmem>>, vector<1x128xf32>
    %6 = vector.broadcast %5 : vector<1x128xf32> to vector<8x128xf32>
    %7 = arith.addf %4, %6 : vector<8x128xf32>
    %cst_6 = arith.constant 0.176776692 : f32
    %8 = vector.broadcast %cst_6 : f32 to vector<8x128xf32>
    %9 = arith.mulf %7, %8 : vector<8x128xf32>
    %c0_7 = arith.constant 0 : index
    %c0_8 = arith.constant 0 : index
    %10 = vector.load %arg4[%c0_7, %c0_8] : memref<128x128xbf16, #tpu.memory_space<vmem>>, vector<128x128xbf16>
    %cst_9 = arith.constant dense<0.000000e+00> : vector<8x128xf32>
    %11 = tpu.matmul %2, %10, %cst_9 {dimension_numbers = #tpu.dot_dimension_numbers<[1], [0], [0], [1], [0, 0, 1, 1], [], []>} : vector<8x128xbf16>, vector<128x128xbf16>, vector<8x128xf32> -> vector<8x128xf32>
    %c0_10 = arith.constant 0 : index
    %c0_11 = arith.constant 0 : index
    %12 = vector.load %arg5[%c0_10, %c0_11] : memref<1x128xf32, #tpu.memory_space<vmem>>, vector<1x128xf32>
    %13 = vector.broadcast %12 : vector<1x128xf32> to vector<8x128xf32>
    %14 = arith.addf %11, %13 : vector<8x128xf32>
    %15 = vector.shape_cast %9 : vector<8x128xf32> to vector<1x8x128xf32>
    %16 = arith.truncf %15 : vector<1x8x128xf32> to vector<1x8x128xbf16>
    %17 = vector.shape_cast %14 : vector<8x128xf32> to vector<1x8x128xf32>
    %18 = arith.truncf %17 : vector<1x8x128xf32> to vector<1x8x128xbf16>
    %cst_12 = arith.constant 0.000000e+00 : f32
    %19 = vector.broadcast %cst_12 : f32 to vector<1x8x8xf32>
    %20 = vector.extract_strided_slice %16 {offsets = [0, 0, 0], sizes = [1, 8, 32], strides = [1, 1, 1]} : vector<1x8x128xbf16> to vector<1x8x32xbf16>
    %21 = vector.extract_strided_slice %18 {offsets = [0, 0, 0], sizes = [1, 8, 32], strides = [1, 1, 1]} : vector<1x8x128xbf16> to vector<1x8x32xbf16>
    %cst_13 = arith.constant dense<0.000000e+00> : vector<1x8x8xf32>
    %22 = tpu.matmul %20, %21, %cst_13 {dimension_numbers = #tpu.dot_dimension_numbers<[2], [2], [1], [1], [0, 0, 0, 1, 1, 1], [0], [0]>} : vector<1x8x32xbf16>, vector<1x8x32xbf16>, vector<1x8x8xf32> -> vector<1x8x8xf32>
    %cst_14 = arith.constant dense<0xFF800000> : vector<1x8xf32>
    %23 = vector.multi_reduction <maximumf>, %22, %cst_14 [2] : vector<1x8x8xf32> to vector<1x8xf32>
    %24 = vector.shape_cast %23 : vector<1x8xf32> to vector<1x8x1xf32>
    %25 = vector.broadcast %24 : vector<1x8x1xf32> to vector<1x8x8xf32>
    %26 = arith.subf %22, %25 : vector<1x8x8xf32>
    %27 = math.exp %26 : vector<1x8x8xf32>
    %cst_15 = arith.constant dense<0.000000e+00> : vector<1x8xf32>
    %28 = vector.multi_reduction <add>, %27, %cst_15 [2] : vector<1x8x8xf32> to vector<1x8xf32>
    %29 = vector.shape_cast %28 : vector<1x8xf32> to vector<1x8x1xf32>
    %30 = tpu.reciprocal %29 {approx = true} : vector<1x8x1xf32> -> vector<1x8x1xf32>
    %31 = vector.broadcast %30 : vector<1x8x1xf32> to vector<1x8x8xf32>
    %32 = arith.mulf %27, %31 : vector<1x8x8xf32>
    %33 = arith.addf %19, %32 : vector<1x8x8xf32>
    %34 = vector.extract_strided_slice %16 {offsets = [0, 0, 32], sizes = [1, 8, 32], strides = [1, 1, 1]} : vector<1x8x128xbf16> to vector<1x8x32xbf16>
    %35 = vector.extract_strided_slice %18 {offsets = [0, 0, 32], sizes = [1, 8, 32], strides = [1, 1, 1]} : vector<1x8x128xbf16> to vector<1x8x32xbf16>
    %cst_16 = arith.constant dense<0.000000e+00> : vector<1x8x8xf32>
    %36 = tpu.matmul %34, %35, %cst_16 {dimension_numbers = #tpu.dot_dimension_numbers<[2], [2], [1], [1], [0, 0, 0, 1, 1, 1], [0], [0]>} : vector<1x8x32xbf16>, vector<1x8x32xbf16>, vector<1x8x8xf32> -> vector<1x8x8xf32>
    %cst_17 = arith.constant dense<0xFF800000> : vector<1x8xf32>
    %37 = vector.multi_reduction <maximumf>, %36, %cst_17 [2] : vector<1x8x8xf32> to vector<1x8xf32>
    %38 = vector.shape_cast %37 : vector<1x8xf32> to vector<1x8x1xf32>
    %39 = vector.broadcast %38 : vector<1x8x1xf32> to vector<1x8x8xf32>
    %40 = arith.subf %36, %39 : vector<1x8x8xf32>
    %41 = math.exp %40 : vector<1x8x8xf32>
    %cst_18 = arith.constant dense<0.000000e+00> : vector<1x8xf32>
    %42 = vector.multi_reduction <add>, %41, %cst_18 [2] : vector<1x8x8xf32> to vector<1x8xf32>
    %43 = vector.shape_cast %42 : vector<1x8xf32> to vector<1x8x1xf32>
    %44 = tpu.reciprocal %43 {approx = true} : vector<1x8x1xf32> -> vector<1x8x1xf32>
    %45 = vector.broadcast %44 : vector<1x8x1xf32> to vector<1x8x8xf32>
    %46 = arith.mulf %41, %45 : vector<1x8x8xf32>
    %47 = arith.addf %33, %46 : vector<1x8x8xf32>
    %48 = vector.extract_strided_slice %16 {offsets = [0, 0, 64], sizes = [1, 8, 32], strides = [1, 1, 1]} : vector<1x8x128xbf16> to vector<1x8x32xbf16>
    %49 = vector.extract_strided_slice %18 {offsets = [0, 0, 64], sizes = [1, 8, 32], strides = [1, 1, 1]} : vector<1x8x128xbf16> to vector<1x8x32xbf16>
    %cst_19 = arith.constant dense<0.000000e+00> : vector<1x8x8xf32>
    %50 = tpu.matmul %48, %49, %cst_19 {dimension_numbers = #tpu.dot_dimension_numbers<[2], [2], [1], [1], [0, 0, 0, 1, 1, 1], [0], [0]>} : vector<1x8x32xbf16>, vector<1x8x32xbf16>, vector<1x8x8xf32> -> vector<1x8x8xf32>
    %cst_20 = arith.constant dense<0xFF800000> : vector<1x8xf32>
    %51 = vector.multi_reduction <maximumf>, %50, %cst_20 [2] : vector<1x8x8xf32> to vector<1x8xf32>
    %52 = vector.shape_cast %51 : vector<1x8xf32> to vector<1x8x1xf32>
    %53 = vector.broadcast %52 : vector<1x8x1xf32> to vector<1x8x8xf32>
    %54 = arith.subf %50, %53 : vector<1x8x8xf32>
    %55 = math.exp %54 : vector<1x8x8xf32>
    %cst_21 = arith.constant dense<0.000000e+00> : vector<1x8xf32>
    %56 = vector.multi_reduction <add>, %55, %cst_21 [2] : vector<1x8x8xf32> to vector<1x8xf32>
    %57 = vector.shape_cast %56 : vector<1x8xf32> to vector<1x8x1xf32>
    %58 = tpu.reciprocal %57 {approx = true} : vector<1x8x1xf32> -> vector<1x8x1xf32>
    %59 = vector.broadcast %58 : vector<1x8x1xf32> to vector<1x8x8xf32>
    %60 = arith.mulf %55, %59 : vector<1x8x8xf32>
    %61 = arith.addf %47, %60 : vector<1x8x8xf32>
    %62 = vector.extract_strided_slice %16 {offsets = [0, 0, 96], sizes = [1, 8, 32], strides = [1, 1, 1]} : vector<1x8x128xbf16> to vector<1x8x32xbf16>
    %63 = vector.extract_strided_slice %18 {offsets = [0, 0, 96], sizes = [1, 8, 32], strides = [1, 1, 1]} : vector<1x8x128xbf16> to vector<1x8x32xbf16>
    %cst_22 = arith.constant dense<0.000000e+00> : vector<1x8x8xf32>
    %64 = tpu.matmul %62, %63, %cst_22 {dimension_numbers = #tpu.dot_dimension_numbers<[2], [2], [1], [1], [0, 0, 0, 1, 1, 1], [0], [0]>} : vector<1x8x32xbf16>, vector<1x8x32xbf16>, vector<1x8x8xf32> -> vector<1x8x8xf32>
    %cst_23 = arith.constant dense<0xFF800000> : vector<1x8xf32>
    %65 = vector.multi_reduction <maximumf>, %64, %cst_23 [2] : vector<1x8x8xf32> to vector<1x8xf32>
    %66 = vector.shape_cast %65 : vector<1x8xf32> to vector<1x8x1xf32>
    %67 = vector.broadcast %66 : vector<1x8x1xf32> to vector<1x8x8xf32>
    %68 = arith.subf %64, %67 : vector<1x8x8xf32>
    %69 = math.exp %68 : vector<1x8x8xf32>
    %cst_24 = arith.constant dense<0.000000e+00> : vector<1x8xf32>
    %70 = vector.multi_reduction <add>, %69, %cst_24 [2] : vector<1x8x8xf32> to vector<1x8xf32>
    %71 = vector.shape_cast %70 : vector<1x8xf32> to vector<1x8x1xf32>
    %72 = tpu.reciprocal %71 {approx = true} : vector<1x8x1xf32> -> vector<1x8x1xf32>
    %73 = vector.broadcast %72 : vector<1x8x1xf32> to vector<1x8x8xf32>
    %74 = arith.mulf %69, %73 : vector<1x8x8xf32>
    %75 = arith.addf %61, %74 : vector<1x8x8xf32>
    %cst_25 = arith.constant 2.500000e-01 : f32
    %76 = vector.broadcast %cst_25 : f32 to vector<1x8x8xf32>
    %77 = arith.mulf %75, %76 : vector<1x8x8xf32>
    %c0_26 = arith.constant 0 : index
    %78 = memref.load %arg6[%c0_26] : memref<1xf32, #tpu.memory_space<smem>>
    %cst_27 = arith.constant 0.000000e+00 : f32
    %79 = arith.subf %cst_27, %78 : f32
    %c0_28 = arith.constant 0 : index
    %c0_29 = arith.constant 0 : index
    %c0_30 = arith.constant 0 : index
    %80 = vector.load %arg7[%c0_28, %c0_29, %c0_30] : memref<1x8x8xf32, #tpu.memory_space<vmem>>, vector<1x8x8xf32>
    %81 = vector.broadcast %79 : f32 to vector<1x8x8xf32>
    %82 = arith.mulf %81, %80 : vector<1x8x8xf32>
    %83 = math.exp %82 : vector<1x8x8xf32>
    %84 = arith.mulf %77, %83 : vector<1x8x8xf32>
    %cst_31 = arith.constant dense<0.000000e+00> : vector<1x8xf32>
    %85 = vector.multi_reduction <add>, %84, %cst_31 [2] : vector<1x8x8xf32> to vector<1x8xf32>
    %86 = vector.shape_cast %85 : vector<1x8xf32> to vector<1x8x1xf32>
    %cst_32 = arith.constant 9.99999993E-9 : f32
    %87 = vector.broadcast %cst_32 : f32 to vector<1x8x1xf32>
    %88 = arith.addf %86, %87 : vector<1x8x1xf32>
    %89 = tpu.reciprocal %88 {approx = true} : vector<1x8x1xf32> -> vector<1x8x1xf32>
    %90 = vector.broadcast %89 : vector<1x8x1xf32> to vector<1x8x8xf32>
    %91 = arith.mulf %84, %90 : vector<1x8x8xf32>
    %cst_33 = arith.constant dense<0.000000e+00> : vector<1x8x128xf32>
    %92 = tpu.matmul %91, %0, %cst_33 {dimension_numbers = #tpu.dot_dimension_numbers<[2], [1], [1], [2], [0, 0, 0, 1, 1, 2], [0], [0]>} : vector<1x8x8xf32>, vector<1x8x128xf32>, vector<1x8x128xf32> -> vector<1x8x128xf32>
    %c0_34 = arith.constant 0 : index
    %c0_35 = arith.constant 0 : index
    %c0_36 = arith.constant 0 : index
    %93 = vector.load %arg8[%c0_34, %c0_35, %c0_36] : memref<1x8x128xf32, #tpu.memory_space<vmem>>, vector<1x8x128xf32>
    tpu.vector_store %arg8[%c0_34, %c0_35, %c0_36], %92 {strides = array<i32>} : memref<1x8x128xf32, #tpu.memory_space<vmem>>, vector<1x8x128xf32>,
    %c0_37 = arith.constant 0 : index
    %c0_38 = arith.constant 0 : index
    %c0_39 = arith.constant 0 : index
    %94 = vector.load %arg9[%c0_37, %c0_38, %c0_39] : memref<1x8x8xf32, #tpu.memory_space<vmem>>, vector<1x8x8xf32>
    tpu.vector_store %arg9[%c0_37, %c0_38, %c0_39], %91 {strides = array<i32>} : memref<1x8x8xf32, #tpu.memory_space<vmem>>, vector<1x8x8xf32>,
    return
  }
  func.func @transform_0(%arg0: i32) -> (i32, i32, i32) {
    %c0_i32 = arith.constant 0 : i32
    %c0_i32_0 = arith.constant 0 : i32
    %c0_i32_1 = arith.constant 0 : i32
    return %arg0, %c0_i32, %c0_i32_0 : i32, i32, i32
  }
  func.func @transform_1(%arg0: i32) -> (i32, i32) {
    %c0_i32 = arith.constant 0 : i32
    %c0_i32_0 = arith.constant 0 : i32
    %c0_i32_1 = arith.constant 0 : i32
    return %c0_i32, %c0_i32_0 : i32, i32
  }
  func.func @transform_2(%arg0: i32) -> (i32, i32) {
    %c0_i32 = arith.constant 0 : i32
    %c0_i32_0 = arith.constant 0 : i32
    %c0_i32_1 = arith.constant 0 : i32
    return %c0_i32, %c0_i32_0 : i32, i32
  }
  func.func @transform_3(%arg0: i32) -> (i32, i32) {
    %c0_i32 = arith.constant 0 : i32
    %c0_i32_0 = arith.constant 0 : i32
    %c0_i32_1 = arith.constant 0 : i32
    return %c0_i32, %c0_i32_0 : i32, i32
  }
  func.func @transform_4(%arg0: i32) -> (i32, i32) {
    %c0_i32 = arith.constant 0 : i32
    %c0_i32_0 = arith.constant 0 : i32
    %c0_i32_1 = arith.constant 0 : i32
    return %c0_i32, %c0_i32_0 : i32, i32
  }
  func.func @transform_5(%arg0: i32) -> i32 {
    %c0_i32 = arith.constant 0 : i32
    %c0_i32_0 = arith.constant 0 : i32
    return %c0_i32 : i32
  }
  func.func @transform_6(%arg0: i32) -> (i32, i32, i32) {
    %c0_i32 = arith.constant 0 : i32
    %c0_i32_0 = arith.constant 0 : i32
    %c0_i32_1 = arith.constant 0 : i32
    return %arg0, %c0_i32, %c0_i32_0 : i32, i32, i32
  }
  func.func @transform_7(%arg0: i32) -> (i32, i32, i32) {
    %c0_i32 = arith.constant 0 : i32
    %c0_i32_0 = arith.constant 0 : i32
    %c0_i32_1 = arith.constant 0 : i32
    return %arg0, %c0_i32, %c0_i32_0 : i32, i32, i32
  }
  func.func @transform_8(%arg0: i32) -> (i32, i32, i32) {
    %c0_i32 = arith.constant 0 : i32
    %c0_i32_0 = arith.constant 0 : i32
    %c0_i32_1 = arith.constant 0 : i32
    return %arg0, %c0_i32, %c0_i32_0 : i32, i32, i32
  }
}

</mosaic_0001>

<bundles_post_ra>
// kernel: tpu_custom_call.1
= control target key start
LH: loop header
LB: loop body
LE: loop exit
PB: predicated region body
PF: predicated region fallthrough
CT: control target
= control target key end

     0   :  { %s1943_s0 = inlined_call_operand.hbm [shape: f32[2,8,128], index: 0, kind: input, shape index: {}]   ;;  %s1944_s1 = inlined_call_operand.hbm [shape: bf16[128,128], index: 1, kind: input, shape index: {}]   ;;  %s1945_s2 = inlined_call_operand.vmem [shape: f32[1,128], index: 2, kind: input, shape index: {}]   ;;  %s1946_s3 = inlined_call_operand.hbm [shape: bf16[128,128], index: 3, kind: input, shape index: {}]   ;;  %s1947_s4 = inlined_call_operand.vmem [shape: f32[1,128], index: 4, kind: input, shape index: {}]   ;;  %s1948_s5 = inlined_call_operand.<no memory space> [shape: f32[1], index: 5, kind: input, shape index: {}]   ;;  %s1949_s6 = inlined_call_operand.vmem [shape: f32[2,8,8], index: 6, kind: input, shape index: {}]   ;;  %s1950_s7 = inlined_call_operand.hbm [shape: f32[2,8,128], index: 7, kind: output, shape index: {0}]   ;;  %s1951_s8 = inlined_call_operand.hbm [shape: f32[2,8,8], index: 8, kind: output, shape index: {1}]  }
   0x1   :  { %14 = sst [smem:[#allocation2]] %s1948_s5 }
   0x2   :  { %15 = vsyncpa [#allocation4], 0 }
   0x3   :  { %17 = vsyncpa [#allocation4 + $0x1], 0 }
   0x4   :  { %18 = vsyncpa [#allocation7], 0 }
   0x5   :  { %19 = vsyncpa [#allocation5], 0 }
   0x6   :  { %21 = vsyncpa [#allocation5 + $0x1], 0 }
   0x7   :  { %22 = vsyncpa [#allocation11], 0 }
   0x8   :  { %24 = vsyncpa [#allocation11 + $0x1], 0  ;;  %s1615_s29 = smov 0   ;;  %s1617_s30 = smov 0  }
   0x9   :  { %s1619_s9 = smov 0   ;;  %s1621_s10 = smov 0  }
   0xa LB: > { %s1636_s5 = sadd.s32 4294967295, %s1553_s10   ;;  %s1110_s11 = sadd.s32 4294967294, %s1553_s10   ;;  %s1553_s10 = sphi %s1621_s10, %s1971_s10   ;;  %s1549_s9 = sphi %s1619_s9, %s1970_s9   ;;  %s1545_s30 = sphi %s1617_s30, %s1969_s30   ;;  %s1541_s29 = sphi %s1615_s29, %s1968_s29  }
   0xb   : > { %p50_p0 = scmp.ne.s32.totalorder %s1545_s30, %s1541_s29  ;;  %p1952_p1 = scmp.eq.s32.totalorder %s1636_s5, 0 }
   0xc   : > { %p211_p3 = scmp.eq.s32.totalorder %s1110_s11, 1  ;;  %p1111_p5 = scmp.ge.s32.totalorder %s1553_s10, 1 }
   0xd   : > { %p1645_p4 = por %p1952_p1, %p50_p0  ;;  %p244_p7 = scmp.lt.s32.totalorder %s1553_s10, 3 }
   0xe   : > { %p1650_p6 = por %p211_p3, %p50_p0  ;;  %s1555_s15 = smov [#allocation6]  }
   0xf   : > { %s1955_s12 = scalar_select %p1645_p4, 1, 0 }
  0x10   : > { %s1956_s13 = scalar_select %p1650_p6, 1, 0 }
  0x11   : > { %p1655_p8 = pnand %p1111_p5, %p244_p7  ;;  %s256_s16 = sshll.u32 %s1555_s15, 4  ;;  %s1659_s16 = int_to_ptr.vmem [resolvable:$true] %s256_s16 }
  0x12   : > { %s1556_s18 = smov [#allocation8]   ;;  %s1365_s22 = scalar_lea.hbm %s1944_s1, 1024 }
  0x13   : > { %p1264_p9 = pneg %p1655_p8  ;;  %s272_s19 = sshll.u32 %s1556_s18, 4  ;;  %s1670_s19 = int_to_ptr.vmem [resolvable:$true] %s272_s19 }
  0x14   : > { %p1366_p12 = scmp.ne.s32.totalorder %s1944_s1, %s1365_s22  ;;  %p1372_p5 = scmp.lt.u32.totalorder %s1365_s22, %s1944_s1 }
  0x15   : > { %p1666_p11 = pnand %p1264_p9, %p1952_p1 }
  0x17   : > { %p1367_p13 = pneg %p1666_p11 }
  0x19   : > { %p1368_p0 = pnand %p1367_p13, %p1366_p12 }
  0x1b   : > { %p1369_p3 = pneg %p1368_p0 }
  0x1d   : > { %p1374_p7 = pnand %p1372_p5, %p1369_p3 }
  0x1f   : > { %1377 = shalt.err (!%p1374_p7)
}
  0x20   : > { %s1378_s27 = scalar_lea.vmem %s1659_s16, 1024  ;;  %p1386_p2 = scmp.lt.s32.totalorder %s1659_s16, %s1659_s16 }
  0x21   : > { %p1379_p9 = scmp.ne.s32.totalorder %s1659_s16, %s1378_s27  ;;  %p1387_p12 = scmp.lt.s32.totalorder %s1378_s27, %s1378_s27 }
  0x23   : > { %p1381_p10 = pnand %p1379_p9, %p1367_p13  ;;  %p1388_p0 = por %p1387_p12, %p1386_p2 }
  0x25   : > { %p1382_p1 = pneg %p1381_p10 }
  0x27   : > { %p1389_p6 = pnand %p1388_p0, %p1382_p1 }
  0x29   : > { %1392 = shalt.err (!%p1389_p6)
}
  0x2a   : > { %s1557_s28 = smov 64   ;;  %s1558_s11 = smov 4  }
  0x2b   : > { %1267 = dma.hbm_to_vmem [thread:$0]  (!%p1666_p11), %s1944_s1, 1024, %s1659_s16, [#allocation7], %s1557_s28, %s1557_s28, %s1558_s11  }
  0x2c   : > { %s1393_s22 = scalar_lea.hbm %s1946_s3, 1024 }
  0x2d   : > { %p1394_p2 = scmp.ne.s32.totalorder %s1946_s3, %s1393_s22  ;;  %p1400_p10 = scmp.lt.u32.totalorder %s1393_s22, %s1946_s3 }
  0x2f   : > { %p1396_p1 = pnand %p1394_p2, %p1367_p13 }
  0x31   : > { %p1397_p6 = pneg %p1396_p1 }
  0x33   : > { %p1402_p3 = pnand %p1400_p10, %p1397_p6 }
  0x35   : > { %1405 = shalt.err (!%p1402_p3)
}
  0x36   : > { %s1406_s16 = scalar_lea.vmem %s1670_s19, 1024  ;;  %p1414_p12 = scmp.lt.s32.totalorder %s1670_s19, %s1670_s19 }
  0x37   : > { %p1407_p5 = scmp.ne.s32.totalorder %s1670_s19, %s1406_s16  ;;  %p1415_p0 = scmp.lt.s32.totalorder %s1406_s16, %s1406_s16 }
  0x39   : > { %p1409_p7 = pnand %p1407_p5, %p1367_p13  ;;  %p1416_p2 = por %p1415_p0, %p1414_p12 }
  0x3b   : > { %p1410_p9 = pneg %p1409_p7 }
  0x3d   : > { %p1417_p1 = pnand %p1416_p2, %p1410_p9 }
  0x3f   : > { %1420 = shalt.err (!%p1417_p1)
}
  0x40   : > { %1270 = dma.hbm_to_vmem [thread:$0]  (!%p1666_p11), %s1946_s3, 1024, %s1670_s19, [#allocation7], %s1557_s28, %s1557_s28, %s1558_s11  }
  0x41   : > { %s1725_s18 = sadd.s32 1, %s1553_s10   ;;  %s37_s17 = sadd.s32 1, %s1549_s9 }
  0x42   : > { %s34_s20 = ssub.s32 %s1553_s10, %s1725_s18  ;;  %p44_p13 = scmp.ne.s32.totalorder %s1549_s9, %s1545_s30 }
  0x43   : > { %p35_p6 = scmp.eq.s32.totalorder %s34_s20, 0  ;;  %p45_p10 = scmp.eq.s32.totalorder %s1553_s10, 0 }
  0x44   : > { %p1959_p3 = scmp.eq.s32.totalorder %s1636_s5, 1  ;;  %p1284_p7 = scmp.lt.s32.totalorder %s1553_s10, 2 }
  0x45   : > { %s1741_s22 = scalar_select %p35_p6, %s1549_s9, %s37_s17  }
  0x46   : > { %p1735_p5 = por %p1959_p3, %p44_p13  ;;  %p46_p9 = por %p45_p10, %p44_p13 }
  0x47   : > { %s292_s23 = sand.u32 1, %s1549_s9   ;;  %s1116_s19 = sshll.u32 %s1553_s10, 7 }
  0x48   : > { %s1960_s21 = scalar_select %p1735_p5, 1, 0 }
  0x49   : > { %s1115_s24 = sshll.u32 %s292_s23, 3  ;;  %s1748_s25 = scalar_lea.hbm %s1943_s0, %s1116_s19 }
  0x4a   : > { %s296_s26 = scalar_lea.vmem [#allocation3], %s1115_s24  ;;  %p1752_p11 = pnand %p1284_p7, %p46_p9 }
  0x4b   : > { %s303_s16 = sshll.u32 %s296_s26, 4  ;;  %s293_s15 = scalar_lea.sflag [#allocation4], %s292_s23  ;;  %s1750_s16 = int_to_ptr.vmem [resolvable:$true] %s303_s16 }
  0x4c   : > { %s1421_s17 = scalar_lea.hbm %s1748_s25, 128  ;;  %p1423_p0 = pneg %p1752_p11 }
  0x4d   : > { %p1422_p12 = scmp.ne.s32.totalorder %s1748_s25, %s1421_s17  ;;  %s1426_s19 = scalar_lea.hbm %s1943_s0, 256 }
  0x4e   : > { %p1427_p13 = scmp.lt.u32.totalorder %s1748_s25, %s1943_s0  ;;  %p1428_p6 = scmp.lt.u32.totalorder %s1426_s19, %s1421_s17 }
  0x4f   : > { %p1424_p2 = pnand %p1423_p0, %p1422_p12  ;;  %p1430_p3 = scmp.lt.u32.totalorder %s1421_s17, %s1748_s25 }
  0x50   : > { %p1429_p10 = por %p1428_p6, %p1427_p13 }
  0x51   : > { %p1425_p1 = pneg %p1424_p2 }
  0x52   : > { %p1431_p7 = por %p1430_p3, %p1429_p10 }
  0x54   : > { %p1432_p9 = pnand %p1431_p7, %p1425_p1 }
  0x56   : > { %1435 = shalt.err (!%p1432_p9)
}
  0x57   : > { %s1436_s23 = scalar_lea.vmem %s1750_s16, 128  ;;  %s1559_s26 = smov [#allocation3]  }
  0x58   : > { %p1437_p12 = scmp.ne.s32.totalorder %s1750_s16, %s1436_s23  ;;  %s1441_s20 = sshll.u32 %s1559_s26, 4  ;;  %s1442_s20 = int_to_ptr.vmem [resolvable:$false] %s1441_s20 }
  0x59   : > { %s1443_s24 = scalar_lea.vmem %s1442_s20, 256  ;;  %p1444_p4 = scmp.lt.s32.totalorder %s1750_s16, %s1442_s20 }
  0x5a   : > { %p1439_p2 = pnand %p1437_p12, %p1423_p0  ;;  %p1445_p13 = scmp.lt.s32.totalorder %s1443_s24, %s1436_s23 }
  0x5c   : > { %p1440_p5 = pneg %p1439_p2  ;;  %p1446_p6 = por %p1445_p13, %p1444_p4 }
  0x5e   : > { %p1447_p10 = pnand %p1446_p6, %p1440_p5 }
  0x60   : > { %1450 = shalt.err (!%p1447_p10)
}
  0x61   : > { %1274 = dma.hbm_to_vmem [thread:$0]  (!%p1752_p11), %s1748_s25, 128, %s1750_s16, %s293_s15  }
  0x62   : > { %319 = sbr.rel (%p1655_p8) target bundleno = 1406 (0x57e), region = 48  ;;  %s1784_s17 = sand.u32 (!%p1655_p8), 1, %s1545_s30  }
  0x63   : > { %s1787_s19 = sshll.u32 (!%p1655_p8), %s1784_s17, 3  ;;  %s322_s28 = scalar_lea.sflag (!%p1655_p8), [#allocation4], %s1784_s17 }
  0x64   : > { %s325_s11 = scalar_lea.vmem (!%p1655_p8), [#allocation3], %s1787_s19  ;;  %p1962_p4 = scmp.ne.s32.totalorder (!%p1655_p8), %s1955_s12, 0 }
  0x69   : > { %1524 = dma.done.wait (%p1962_p4), %s322_s28, 128  }
  0x6a   : > { %1526 = vsyncadd (%p1962_p4), %s322_s28, 4294967168  ;;  %p1963_p5 = scmp.eq.s32.totalorder %s1636_s5, 0 }
  0x6c   : > { %1528 = dma.done.wait (%p1963_p5), [#allocation7], 2048   ;;  %p1964_p8 = pmov %p1963_p5 }
  0x6d   : > { %v1560_v0 = vmov 0.0   ;;  %vm1561_vm0 = vmmov 0   ;;  %v1329_v1 = vld [vmem:[#allocation6] sm:$0xff]   ;;  %v1331_v3 = vld [vmem:[#allocation6 + $0x8] sm:$0xff]   ;;  %v1333_v5 = vld [vmem:[#allocation6 + $0x10] sm:$0xff]   ;;  %vm607_vm1 = vcmask 261120  }
  0x6e   : > { %1530 = vsyncadd (%p1964_p8), [#allocation7], 4294965248  ;;  %1181 = vmatprep.subr.bf16.mxu0 %v1560_v0  ;;  %1201 = vmatprep.subr.bf16.mxu1 %v1560_v0  ;;  %v1330_v2 = vld [vmem:[#allocation8] sm:$0xff]   ;;  %v1332_v4 = vld [vmem:[#allocation8 + $0x8] sm:$0xff]   ;;  %s1562_s27 = smov 96   ;;  %s1563_s15 = smov 64  }
  0x6f   : > { %1197 = vmatprep.mubr.msk.bf16.mxu0 %vm1561_vm0, %v1560_v0  ;;  %1217 = vmatprep.mubr.msk.bf16.mxu1 %vm1561_vm0, %v1560_v0  ;;  %v1334_v6 = vld [vmem:[#allocation8 + $0x10] sm:$0xff]   ;;  %v1335_v7 = vld [vmem:[#allocation6 + $0x18] sm:$0xff]   ;;  %v1337_v9 = vld [vmem:[#allocation6 + $0x20] sm:$0xff]   ;;  %s1564_s23 = smov 32   ;;  %vm654_vm2 = vcmask 64512   ;;  %p375_p11 = scmp.lt.s32.totalorder %s1636_s5, 1 }
  0x70   : > { %1182 = vmatpush3.bf16.msra.mxu0 %v1329_v1  ;;  %1202 = vmatpush3.bf16.msra.mxu1 %v1330_v2  ;;  %v1336_v8 = vld [vmem:[#allocation8 + $0x18] sm:$0xff]   ;;  %v1338_v10 = vld [vmem:[#allocation8 + $0x20] sm:$0xff]   ;;  %v1339_v11 = vld [vmem:[#allocation6 + $0x28] sm:$0xff]   ;;  %s856_s26 = sld [smem:[#allocation2]]  ;;  %s374_s25 = scalar_lea.vmem [#allocation10], %s1787_s19 }
  0x71   : > { %1183 = vmatprep.subr.bf16.mxu0 %v1560_v0  ;;  %1203 = vmatprep.subr.bf16.mxu1 %v1560_v0  ;;  %v1340_v12 = vld [vmem:[#allocation8 + $0x28] sm:$0xff]   ;;  %v1341_v13 = vld [vmem:[#allocation6 + $0x30] sm:$0xff]   ;;  %v1343_v15 = vld [vmem:[#allocation6 + $0x38] sm:$0xff]   ;;  %s376_s20 = scalar_select %p375_p11, %s1636_s5, 1 }
  0x72   : > { %v1342_v14 = vld [vmem:[#allocation8 + $0x30] sm:$0xff]   ;;  %v1344_v17 = vld [vmem:[#allocation8 + $0x38] sm:$0xff]   ;;  %s1149_s16 = sshll.u32 %s1636_s5, 7  ;;  %p1965_p1 = scmp.ne.s32.totalorder %s1960_s21, 0 }
  0x73   : > { %v380_v16 = vld [vmem:[%s325_s11] sm:$0xff]  ;;  %s1123_s24 = sshll.u32 %s376_s20, 3  ;;  %s951_s20 = scalar_lea.sflag [#allocation11], %s1784_s17 }
  0x74   : > { %1184 = vmatpush3.bf16.msra.mxu0 %v1331_v3  ;;  %1204 = vmatpush3.bf16.msra.mxu1 %v1332_v4  ;;  %v381_v18 = vpack.c.bf16 %v380_v16, %v380_v16  ;;  %v1124_v19 = vld [vmem:[%s1945_s2] ss:$0 sm:$0xff]  ;;  %s378_s14 = scalar_lea.vmem %s1949_s6, %s1123_s24 }
  0x75   : > { %1185 = vmatprep.subr.bf16.mxu0 %v1560_v0  ;;  %1205 = vmatprep.subr.bf16.mxu1 %v1560_v0  ;;  %v1133_v20 = vld [vmem:[%s1947_s4] ss:$0 sm:$0xff] }
  0x76   : > { %s857_s28 = ssub.f32 0.0, %s856_s26  ;;  %s977_s26 = sshll.u32 %s374_s25, 4  ;;  %s978_s26 = int_to_ptr.vmem [resolvable:$true] %s977_s26 }
  0x77   : > { %s1451_s24 = scalar_lea.vmem %s978_s26, 128 }
  0x78   : > { %1186 = vmatpush3.bf16.msra.mxu0 %v1333_v5  ;;  %1206 = vmatpush3.bf16.msra.mxu1 %v1334_v6  ;;  %p1452_p0 = scmp.ne.s32.totalorder %s978_s26, %s1451_s24 }
  0x79   : > { %1187 = vmatprep.subr.bf16.mxu0 %v1560_v0  ;;  %1207 = vmatprep.subr.bf16.mxu1 %v1560_v0 }
  0x7a   : > { %p1453_p3 = pnand %p1452_p0, %p1965_p1 }
  0x7c   : > { %1188 = vmatpush3.bf16.msra.mxu0 %v1335_v7  ;;  %1208 = vmatpush3.bf16.msra.mxu1 %v1336_v8  ;;  %p1454_p7 = pneg %p1453_p3 }
  0x7d   : > { %1189 = vmatprep.subr.bf16.mxu0 %v1560_v0  ;;  %1209 = vmatprep.subr.bf16.mxu1 %v1560_v0 }
  0x80   : > { %1190 = vmatpush3.bf16.msra.mxu0 %v1337_v9  ;;  %1210 = vmatpush3.bf16.msra.mxu1 %v1338_v10 }
  0x81   : > { %1191 = vmatprep.subr.bf16.mxu0 %v1560_v0  ;;  %1211 = vmatprep.subr.bf16.mxu1 %v1560_v0 }
  0x84   : > { %1192 = vmatpush3.bf16.msra.mxu0 %v1339_v11  ;;  %1212 = vmatpush3.bf16.msra.mxu1 %v1340_v12 }
  0x85   : > { %1193 = vmatprep.subr.bf16.mxu0 %v1560_v0  ;;  %1213 = vmatprep.subr.bf16.mxu1 %v1560_v0 }
  0x88   : > { %1194 = vmatpush3.bf16.msra.mxu0 %v1341_v13  ;;  %1214 = vmatpush3.bf16.msra.mxu1 %v1342_v14 }
  0x89   : > { %1195 = vmatprep.subr.bf16.mxu0 %v1560_v0  ;;  %1215 = vmatprep.subr.bf16.mxu1 %v1560_v0 }
  0x8c   : > { %1196 = vmatpush3.bf16.msra.mxu0 %v1343_v15  ;;  %1216 = vmatpush3.bf16.msra.mxu1 %v1344_v17 }
  0x8d   : > { %1221 = vmatprep.subr.bf16.mxu0 %v1560_v0  ;;  %1227 = vmatprep.subr.bf16.mxu1 %v1560_v0 }
  0x8f   : > { %1198 = vmatmul.mubr.bf16.vlgmr.msra.gmra.mrb[0].mxu0 %v381_v18  ;;  %1218 = vmatmul.mubr.bf16.vlgmr.msra.gmra.mrb[0].mxu1 %v381_v18 }
  0x90   : > { %1223 = vmatprep.mubr.msk.bf16.mxu0 %vm1561_vm0, %v1560_v0  ;;  %1229 = vmatprep.mubr.msk.bf16.mxu1 %vm1561_vm0, %v1560_v0 }
 0x162   : > { %v487_v21 = vpop.f32.mrb[0].mxu0  ;;  %v599_v23 = vpop.f32.mrb[0].mxu1 }
 0x163   : > { %v488_v22 = vadd.f32 %v1124_v19, %v487_v21  ;;  %v1199_v24 = vpop.f32.mrb[1].mxu0  ;;  %v600_v25 = vadd.f32 %v1133_v20, %v599_v23  ;;  %v1219_v26 = vpop.f32.mrb[1].mxu1  ;;  %v859_v23 = vstv %s857_s28  ;;  %s1565_s28 = smov [#allocation10]  }
 0x164   : > { %v490_v27 = vpop.f32.mrb[2].mxu0  ;;  %v602_v29 = vpop.f32.mrb[2].mxu1  ;;  %s1455_s11 = sshll.u32 %s1565_s28, 4  ;;  %s1456_s11 = int_to_ptr.vmem [resolvable:$false] %s1455_s11 }
 0x165   : > { %v493_v28 = vmul.f32 0.17677669, %v488_v22  ;;  %v1200_v30 = vpop.f32.mrb[3].mxu0  ;;  %v606_v31 = vpack.c.bf16 %v600_v25, %v600_v25  ;;  %v1220_v32 = vpop.f32.mrb[3].mxu1  ;;  %v858_v22 = vld [vmem:[%s378_s14] sm:$0xff]  ;;  %s1457_s12 = scalar_lea.vmem %s1456_s11, 256  ;;  %p1458_p9 = scmp.lt.s32.totalorder %s978_s26, %s1456_s11 }
 0x166   : > { %v860_v25 = vmul.f32 %v859_v23, %v858_v22  ;;  %p1459_p12 = scmp.lt.s32.totalorder %s1457_s12, %s1451_s24 }
 0x167   : > { %v605_v33 = vpack.c.bf16 %v493_v28, %v493_v28  ;;  %671 = vrot.lane.b32.xlu0 %v606_v31, %s1562_s27  ;;  %v612_v34 = vsel %vm607_vm1, %v606_v31, 0 }
 0x168   : > { %1222 = vmatpush3.bf16.xpose.msra.mxu0 %v612_v34  ;;  %v861_v27 = vmul.f32 1.442695, %v860_v25  ;;  %p1460_p2 = por %p1459_p12, %p1458_p9 }
 0x169   : > { %668 = vrot.lane.b32.xlu1 %v605_v33, %s1562_s27  ;;  %1233 = vmatprep.subr.bf16.mxu0 %v1560_v0 }
 0x16a   : > { %p1461_p13 = pnand %p1460_p2, %p1454_p7 }
 0x16b   : > { %733 = vrot.lane.b32.xlu0 %v606_v31, %s1563_s15 }
 0x16d   : > { %795 = vrot.lane.b32.xlu1 %v606_v31, %s1564_s23 }
 0x16f   : > { %731 = vrot.lane.b32.xlu0 %v605_v33, %s1563_s15  ;;  %1224 = vmatmul.mubr.msk.bf16.vlgmr.msra.gmra.mrb[4].mxu0 %vm607_vm1, %v605_v33 }
 0x170   : > { %1235 = vmatprep.mubr.msk.bf16.mxu0 %vm1561_vm0, %v1560_v0 }
 0x171   : > { %793 = vrot.lane.b32.xlu1 %v605_v33, %s1564_s23  ;;  %s1873_s23 = scalar_lea.hbm %s1951_s8, %s1149_s16 }
 0x1d9   : > { %v672_v35 = vpop.permute.xlu0 %671 }
 0x1da   : > { %v677_v36 = vsel %vm607_vm1, %v672_v35, 0 }
 0x1db   : > { %v669_v37 = vpop.permute.xlu1 %668  ;;  %1228 = vmatpush3.bf16.xpose.msra.mxu1 %v677_v36 }
 0x1dc   : > { %1239 = vmatprep.subr.bf16.mxu1 %v1560_v0 }
 0x1dd   : > { %v734_v38 = vpop.permute.xlu0 %733 }
 0x1de   : > { %v739_v39 = vsel %vm607_vm1, %v734_v38, 0 }
 0x1df   : > { %v796_v40 = vpop.permute.xlu1 %795  ;;  %1234 = vmatpush3.bf16.xpose.msra.mxu0 %v739_v39 }
 0x1e0   : > { %1245 = vmatprep.subr.mxu0 %v1560_v0  ;;  %v801_v41 = vsel %vm607_vm1, %v796_v40, 0 }
 0x1e1   : > { %v732_v42 = vpop.permute.xlu0 %731 }
 0x1e2   : > { %1230 = vmatmul.mubr.msk.bf16.vlgmr.msra.gmra.mrb[4].mxu1 %vm607_vm1, %v669_v37 }
 0x1e3   : > { %1240 = vmatpush3.bf16.xpose.msra.mxu1 %v801_v41  ;;  %1241 = vmatprep.mubr.msk.bf16.mxu1 %vm1561_vm0, %v1560_v0  ;;  %v794_v43 = vpop.permute.xlu1 %793 }
 0x1e6   : > { %1236 = vmatmul.mubr.msk.bf16.vlgmr.msra.gmra.mrb[8].mxu0 %vm607_vm1, %v732_v42 }
 0x1e7   : > { %1246 = vmatpush3.msra.mxu0 %v380_v16  ;;  %1247 = vmatprep.mubr.msk.f32.mxu0 %vm1561_vm0, %v1560_v0 }
 0x1ea   : > { %1242 = vmatmul.mubr.msk.bf16.vlgmr.msra.gmra.mrb[8].mxu1 %vm607_vm1, %v794_v43 }
 0x242   : > { %v648_v44 = vpop.f32.mrb[4].mxu0 }
 0x243   : > { %v1225_v45 = vpop.f32.mrb[5].mxu0  ;;  %v655_v46 = vsel %vm654_vm2, %v648_v44, -inf }
 0x244   : > { %656 = vmax.xlane.f32.xlu0 %v655_v46  ;;  %v651_v47 = vpop.f32.mrb[6].mxu0 }
 0x245   : > { %v1226_v48 = vpop.f32.mrb[7].mxu0 }
 0x2b5   : > { %v713_v49 = vpop.f32.mrb[4].mxu1 }
 0x2b6   : > { %v1231_v50 = vpop.f32.mrb[5].mxu1  ;;  %v719_v51 = vsel %vm654_vm2, %v713_v49, -inf }
 0x2b7   : > { %720 = vmax.xlane.f32.xlu1 %v719_v51  ;;  %v716_v52 = vpop.f32.mrb[6].mxu1 }
 0x2b8   : > { %v1232_v53 = vpop.f32.mrb[7].mxu1 }
 0x2b9   : > { %v775_v54 = vpop.f32.mrb[8].mxu0 }
 0x2ba   : > { %v1237_v55 = vpop.f32.mrb[9].mxu0  ;;  %v781_v56 = vsel %vm654_vm2, %v775_v54, -inf }
 0x2bb   : > { %782 = vmax.xlane.f32.xlu0 %v781_v56  ;;  %v778_v57 = vpop.f32.mrb[10].mxu0 }
 0x2bc   : > { %v1238_v58 = vpop.f32.mrb[11].mxu0 }
 0x2bd   : > { %v837_v59 = vpop.f32.mrb[8].mxu1 }
 0x2be   : > { %v1243_v60 = vpop.f32.mrb[9].mxu1  ;;  %v843_v61 = vsel %vm654_vm2, %v837_v59, -inf }
 0x2bf   : > { %v840_v62 = vpop.f32.mrb[10].mxu1  ;;  %844 = vmax.xlane.f32.xlu0 %v843_v61 }
 0x2c0   : > { %v1244_v63 = vpop.f32.mrb[11].mxu1 }
 0x2d1   : > { %v657_v0 = vpop.xlane.xlu0 %656 }
 0x2d2   : > { %v658_v1 = vsub.f32 %v648_v44, %v657_v0 }
 0x2d4   : > { %v659_v2 = vmul.f32 1.442695, %v658_v1 }
 0x2d6   : > { %1345 = vpow2.f32 %v659_v2 }
 0x2e0   : > { %v1346_v3 = vpop.eup %1345 }
 0x2e1   : > { %v661_v4 = vsel %vm654_vm2, %v1346_v3, 0.0 }
 0x2e2   : > { %662 = vadd.xlane.f32.xlu1 %v661_v4 }
 0x344   : > { %v721_v5 = vpop.xlane.xlu1 %720 }
 0x345   : > { %v722_v6 = vsub.f32 %v713_v49, %v721_v5 }
 0x347   : > { %v723_v7 = vmul.f32 1.442695, %v722_v6 }
 0x348   : > { %v783_v8 = vpop.xlane.xlu0 %782 }
 0x349   : > { %1347 = vpow2.f32 %v723_v7  ;;  %v784_v9 = vsub.f32 %v775_v54, %v783_v8 }
 0x34b   : > { %v785_v10 = vmul.f32 1.442695, %v784_v9 }
 0x34c   : > { %v845_v11 = vpop.xlane.xlu0 %844 }
 0x34d   : > { %1349 = vpow2.f32 %v785_v10  ;;  %v846_v12 = vsub.f32 %v837_v59, %v845_v11 }
 0x34f   : > { %v847_v13 = vmul.f32 1.442695, %v846_v12 }
 0x351   : > { %1351 = vpow2.f32 %v847_v13 }
 0x353   : > { %v1348_v14 = vpop.eup %1347 }
 0x354   : > { %v725_v15 = vsel %vm654_vm2, %v1348_v14, 0.0 }
 0x355   : > { %726 = vadd.xlane.f32.xlu0 %v725_v15 }
 0x357   : > { %v1350_v16 = vpop.eup %1349 }
 0x358   : > { %v787_v17 = vsel %vm654_vm2, %v1350_v16, 0.0 }
 0x359   : > { %788 = vadd.xlane.f32.xlu1 %v787_v17 }
 0x35b   : > { %v1352_v18 = vpop.eup %1351 }
 0x35c   : > { %v849_v19 = vsel %vm654_vm2, %v1352_v18, 0.0 }
 0x35d   : > { %850 = vadd.xlane.f32.xlu0 %v849_v19 }
 0x36f   : > { %v663_v20 = vpop.xlane.xlu1 %662 }
 0x3e2   : > { %v727_v21 = vpop.xlane.xlu0 %726 }
 0x3e3   : > { %1353 = vrcp.f32 %v727_v21 }
 0x3e4   : > { %1355 = vrcp.f32 %v663_v20 }
 0x3e6   : > { %v789_v24 = vpop.xlane.xlu1 %788 }
 0x3e7   : > { %1357 = vrcp.f32 %v789_v24 }
 0x3ea   : > { %v851_v26 = vpop.xlane.xlu0 %850 }
 0x3eb   : > { %1359 = vrcp.f32 %v851_v26 }
 0x3ec   : > { %1361 = vpow2.f32 %v861_v27 }
 0x3ed   : > { %v1354_v28 = vpop.eup %1353 }
 0x3ee   : > { %v1356_v29 = vpop.eup %1355  ;;  %v729_v30 = vmul.f32 %v1354_v28, %v1348_v14 }
 0x3ef   : > { %v665_v32 = vmul.f32 %v1356_v29, %v1346_v3 }
 0x3f1   : > { %v1358_v31 = vpop.eup %1357  ;;  %v730_v34 = vadd.f32 %v729_v30, %v665_v32 }
 0x3f2   : > { %v791_v33 = vmul.f32 %v1358_v31, %v1350_v16 }
 0x3f4   : > { %v792_v36 = vadd.f32 %v791_v33, %v730_v34 }
 0x3f5   : > { %v1360_v35 = vpop.eup %1359 }
 0x3f6   : > { %v853_v37 = vmul.f32 %v1360_v35, %v1352_v18  ;;  %v1362_v39 = vpop.eup %1361 }
 0x3f8   : > { %v854_v38 = vadd.f32 %v853_v37, %v792_v36 }
 0x3fa   : > { %v855_v40 = vmul.f32 0.25, %v854_v38 }
 0x3fc   : > { %v863_v41 = vmul.f32 %v1362_v39, %v855_v40 }
 0x3fe   : > { %v864_v42 = vsel %vm654_vm2, %v863_v41, 0.0 }
 0x3ff   : > { %865 = vadd.xlane.f32.xlu1 %v864_v42 }
 0x48c   : > { %v866_v43 = vpop.xlane.xlu1 %865 }
 0x48d   : > { %v867_v44 = vadd.f32 1e-08, %v866_v43 }
 0x48f   : > { %1363 = vrcp.f32 %v867_v44 }
 0x499   : > { %v1364_v45 = vpop.eup %1363 }
 0x49a   : > { %v869_v46 = vmul.f32 %v1364_v45, %v863_v41 }
 0x49c   : > { %1248 = vmatmul.mubr.msk.f32.vlgmr.msra.gmra.mrb[12].mxu0 %vm654_vm2, %v869_v46  ;;  %944 = vst.msk [vmem:[%s374_s25] sm:$0xff] %vm654_vm2, %v869_v46 }
 0x49d   : > { %1464 = shalt.err (!%p1461_p13)
}
 0x49e   : > { %s1465_s14 = scalar_lea.hbm %s1873_s23, 128  ;;  %s1469_s15 = scalar_lea.hbm %s1951_s8, 256 }
 0x49f   : > { %p1466_p6 = scmp.ne.s32.totalorder %s1873_s23, %s1465_s14  ;;  %p1470_p5 = scmp.lt.u32.totalorder %s1873_s23, %s1951_s8 }
 0x4a0   : > { %p1471_p8 = scmp.lt.u32.totalorder %s1469_s15, %s1465_s14  ;;  %p1473_p0 = scmp.lt.u32.totalorder %s1465_s14, %s1873_s23 }
 0x4a1   : > { %p1467_p10 = pnand %p1466_p6, %p1965_p1 }
 0x4a2   : > { %p1472_p11 = por %p1471_p8, %p1470_p5 }
 0x4a3   : > { %p1468_p4 = pneg %p1467_p10 }
 0x4a4   : > { %p1474_p3 = por %p1473_p0, %p1472_p11 }
 0x4a6   : > { %p1475_p7 = pnand %p1474_p3, %p1468_p4 }
 0x4a8   : > { %1478 = shalt.err (!%p1475_p7)
}
 0x4a9   : > { %1261 = dma.vmem_to_hbm [thread:$0]  (%p1965_p1), %s978_s26, 128, %s1873_s23, %s951_s20  }
 0x4aa   : > { %s367_s24 = scalar_lea.vmem [#allocation9], %s1787_s19  ;;  %s1901_s14 = scalar_lea.hbm %s1950_s7, %s1149_s16 }
 0x4ab   : > { %s964_s12 = sshll.u32 %s367_s24, 4  ;;  %s946_s15 = scalar_lea.sflag [#allocation5], %s1784_s17  ;;  %s1894_s12 = int_to_ptr.vmem [resolvable:$true] %s964_s12 }
 0x4ac   : > { %s1479_s28 = scalar_lea.vmem %s1894_s12, 128  ;;  %s1566_s19 = smov [#allocation9]  }
 0x4ad   : > { %p1480_p9 = scmp.ne.s32.totalorder %s1894_s12, %s1479_s28  ;;  %s1483_s23 = sshll.u32 %s1566_s19, 4  ;;  %s1484_s23 = int_to_ptr.vmem [resolvable:$false] %s1483_s23 }
 0x4ae   : > { %s1485_s5 = scalar_lea.vmem %s1484_s23, 256  ;;  %p1486_p13 = scmp.lt.s32.totalorder %s1894_s12, %s1484_s23 }
 0x4af   : > { %p1481_p12 = pnand %p1480_p9, %p1965_p1  ;;  %p1487_p6 = scmp.lt.s32.totalorder %s1485_s5, %s1479_s28 }
 0x4b1   : > { %p1482_p2 = pneg %p1481_p12  ;;  %p1488_p10 = por %p1487_p6, %p1486_p13 }
 0x4b3   : > { %p1489_p4 = pnand %p1488_p10, %p1482_p2 }
 0x56f   : > { %v939_v47 = vpop.f32.mrb[12].mxu0 }
 0x570   : > { %943 = vst [vmem:[%s367_s24] sm:$0xff] %v939_v47  ;;  %v1249_v48 = vpop.f32.mrb[13].mxu0 }
 0x571   : > { %1492 = shalt.err (!%p1489_p4)
}
 0x572   : > { %s1493_s17 = scalar_lea.hbm %s1901_s14, 128  ;;  %s1497_s20 = scalar_lea.hbm %s1950_s7, 256 }
 0x573   : > { %p1494_p5 = scmp.ne.s32.totalorder %s1901_s14, %s1493_s17  ;;  %p1498_p0 = scmp.lt.u32.totalorder %s1901_s14, %s1950_s7 }
 0x574   : > { %p1499_p3 = scmp.lt.u32.totalorder %s1497_s20, %s1493_s17  ;;  %p1501_p9 = scmp.lt.u32.totalorder %s1493_s17, %s1901_s14 }
 0x575   : > { %p1495_p8 = pnand %p1494_p5, %p1965_p1 }
 0x576   : > { %p1500_p7 = por %p1499_p3, %p1498_p0 }
 0x577   : > { %p1496_p11 = pneg %p1495_p8 }
 0x578   : > { %p1502_p12 = por %p1501_p9, %p1500_p7 }
 0x57a   : > { %p1503_p2 = pnand %p1502_p12, %p1496_p11 }
 0x57c   : > { %1506 = shalt.err (!%p1503_p2)
}
 0x57d   : > { %1260 = dma.vmem_to_hbm [thread:$0]  (%p1965_p1), %s1894_s12, 128, %s1901_s14, %s946_s15  }
 0x57e PF: > { %s989_s25 = sand.u32 1, %s1541_s29   ;;  %p1966_p13 = scmp.ne.s32.totalorder %s1956_s13, 0 }
 0x57f   : > { %p1967_p6 = scmp.ge.s32.totalorder %s1553_s10, 2  ;;  %s990_s27 = scalar_lea.sflag [#allocation5], %s989_s25 }
 0x581   : > { %p1276_p10 = pnand %p1967_p6, %p1966_p13 }
 0x583   : > { %1532 = dma.done.wait (!%p1276_p10), %s990_s27, 128  }
 0x584   : > { %1534 = vsyncadd (!%p1276_p10), %s990_s27, 4294967168  ;;  %s999_s28 = scalar_lea.sflag [#allocation11], %s989_s25 }
 0x585   : > { %1536 = dma.done.wait (!%p1276_p10), %s999_s28, 128  }
 0x586   : > { %1538 = vsyncadd (!%p1276_p10), %s999_s28, 4294967168  ;;  %p27_p1 = scmp.ge.s32.totalorder %s1725_s18, 4   ;;  %s1968_s29 = smov %s1545_s30 }
 0x587   : > { %s1969_s30 = smov %s1549_s9  ;;  %s1970_s9 = smov %s1741_s22 }
 0x588   : > { %s1971_s10 = smov %s1725_s18  ;;  %29 = sbr.rel (!%p27_p1) target bundleno = 10 (0xa), region = 121 }
 0x58f   :  { %1004 = vsyncpa [#allocation4], 1 }
 0x590   :  { %1006 = vsyncpa [#allocation4 + $0x1], 1 }
 0x591   :  { %1007 = vsyncpa [#allocation7], 1 }
 0x592   :  { %1008 = vsyncpa [#allocation5], 1 }
 0x593   :  { %1010 = vsyncpa [#allocation5 + $0x1], 1 }
 0x594   :  { %1011 = vsyncpa [#allocation11], 1 }
 0x595   :  { %1013 = vsyncpa [#allocation11 + $0x1], 1 }

</bundles_post_ra>
